<compile_context>
chip_gen: v7x
topology: tpu7x:2x2x1
jax: 0.10.0
libtpu: 0.0.40
codegen_flags: <defaults>
</compile_context>

<pallas_src>
import jax
import jax.numpy as jnp
from jax.experimental import pallas as pl
from jax.experimental.pallas import tpu as pltpu


_PARTIAL_SHAPE = (8, 128)          # one full f32 vreg per partial block (lane-dense)
_FIXED_OVERHEAD = 64 * 1024        # output blocks + slack, bytes


def _chip_params():
    """Return (vmem_limit_bytes, per-step block budget bytes) per TPU generation."""
    try:
        vmem_phys = int(pltpu.get_tpu_info().vmem_capacity_bytes)
    except Exception:
        vmem_phys = 64 * 1024 * 1024              # conservative (v7x-sized) fallback
    if vmem_phys >= 128 * 1024 * 1024:            # v5e / v6e
        return 64 * 1024 * 1024, 7 * 1024 * 1024
    return 32 * 1024 * 1024, 5 * 1024 * 1024      # v7x (64 MiB physical)


def _pick_channel_chunk(C, H, W, x_itemsize, fixed_bytes, budget_bytes):
    """Largest divisor cc of C whose per-step working set fits the budget.

    Working set ~= double-buffered native-dtype x block + ~4 f32 temporaries of
    the chunk + fixed_bytes (img double-buffer, gray/ih/iw temps, outputs).
    """
    plane = H * W
    per_chan = plane * (2 * x_itemsize + 4 * 4)
    best = 1
    for d in range(1, C + 1):
        if C % d == 0 and d * per_chan + fixed_bytes <= budget_bytes:
            best = d
    return best


# -----------------------------------------------------------------------------
# Kernel 1: unweighted squared-TV partials (img=None path)
# -----------------------------------------------------------------------------
def _tv_plain_kernel(x_ref, hs2_ref, ws2_ref):
    x = x_ref[0].astype(jnp.float32)              # (cc, H, W)
    h_d = x[:, 1:, :] - x[:, :-1, :]              # (cc, H-1, W)
    w_d = x[:, :, 1:] - x[:, :, :-1]              # (cc, H, W-1)
    hs2_ref[...] = jnp.broadcast_to(jnp.sum(h_d * h_d), hs2_ref.shape)
    ws2_ref[...] = jnp.broadcast_to(jnp.sum(w_d * w_d), ws2_ref.shape)


def _tv_sums_plain(x):
    B, C, H, W = x.shape
    vmem_limit, budget = _chip_params()
    cc = _pick_channel_chunk(C, H, W, x.dtype.itemsize, _FIXED_OVERHEAD, budget)
    nc = C // cc
    part = jax.ShapeDtypeStruct((B * nc,) + _PARTIAL_SHAPE, jnp.float32)
    cost = pl.CostEstimate(
        flops=int(6 * B * C * H * W),
        transcendentals=0,
        bytes_accessed=int(x.size * x.dtype.itemsize + 2 * B * nc * 8 * 128 * 4),
    )
    out_idx = lambda b, c: (b * nc + c, 0, 0)
    hs2, ws2 = pl.pallas_call(
        _tv_plain_kernel,
        out_shape=(part, part),
        grid=(B, nc),
        in_specs=[pl.BlockSpec((1, cc, H, W), lambda b, c: (b, c, 0, 0))],
        out_specs=(
            pl.BlockSpec((1,) + _PARTIAL_SHAPE, out_idx),
            pl.BlockSpec((1,) + _PARTIAL_SHAPE, out_idx),
        ),
        compiler_params=pltpu.CompilerParams(
            dimension_semantics=("parallel", "parallel"),
            vmem_limit_bytes=vmem_limit),
        cost_estimate=cost,
    )(x)
    return jnp.sum(hs2[:, 0, 0]), jnp.sum(ws2[:, 0, 0])


# -----------------------------------------------------------------------------
# Kernel 2: fused gray-weighted squared-TV partials (img path, single pass).
#   Emits {sum(d^2), sum(d^2*i), max(i)} per (batch, channel-chunk) block so the
#   wrapper can form  max*sum(d^2) - sum(d^2*i)  — no separate max pre-pass and
#   no weight maps are ever materialized or round-tripped through HBM.
# -----------------------------------------------------------------------------
def _tv_weighted_kernel(x_ref, img_ref,
                        hs2_ref, hsi_ref, hmx_ref,
                        ws2_ref, wsi_ref, wmx_ref):
    x = x_ref[0].astype(jnp.float32)              # (cc, H, W)
    img = img_ref[0].astype(jnp.float32)          # (Ci, H, W)

    gray = jnp.mean(img, axis=0)                  # (H, W)
    ih = jnp.abs(gray[1:, :] - gray[:-1, :])      # (H-1, W)
    iw = jnp.abs(gray[:, 1:] - gray[:, :-1])      # (H, W-1)

    h_d = x[:, 1:, :] - x[:, :-1, :]              # (cc, H-1, W)
    w_d = x[:, :, 1:] - x[:, :, :-1]              # (cc, H, W-1)
    h_sq = h_d * h_d
    w_sq = w_d * w_d

    hs2_ref[...] = jnp.broadcast_to(jnp.sum(h_sq), hs2_ref.shape)
    hsi_ref[...] = jnp.broadcast_to(jnp.sum(h_sq * ih), hsi_ref.shape)
    hmx_ref[...] = jnp.broadcast_to(jnp.max(ih), hmx_ref.shape)
    ws2_ref[...] = jnp.broadcast_to(jnp.sum(w_sq), ws2_ref.shape)
    wsi_ref[...] = jnp.broadcast_to(jnp.sum(w_sq * iw), wsi_ref.shape)
    wmx_ref[...] = jnp.broadcast_to(jnp.max(iw), wmx_ref.shape)


def _tv_sums_weighted(x, img):
    B, C, H, W = x.shape
    Ci = img.shape[1]
    vmem_limit, budget = _chip_params()
    # fixed per-step bytes: double-buffered img block + gray/ih/iw f32 temps + outputs
    fixed = (2 * Ci * H * W * img.dtype.itemsize
             + 4 * H * W * 4
             + _FIXED_OVERHEAD)
    cc = _pick_channel_chunk(C, H, W, x.dtype.itemsize, fixed, budget)
    nc = C // cc
    part = jax.ShapeDtypeStruct((B * nc,) + _PARTIAL_SHAPE, jnp.float32)
    cost = pl.CostEstimate(
        flops=int(10 * B * C * H * W + 6 * B * Ci * H * W),
        transcendentals=0,
        bytes_accessed=int(x.size * x.dtype.itemsize
                           + img.size * img.dtype.itemsize
                           + 6 * B * nc * 8 * 128 * 4),
    )
    out_idx = lambda b, c: (b * nc + c, 0, 0)
    hs2, hsi, hmx, ws2, wsi, wmx = pl.pallas_call(
        _tv_weighted_kernel,
        out_shape=(part,) * 6,
        grid=(B, nc),
        in_specs=[
            pl.BlockSpec((1, cc, H, W), lambda b, c: (b, c, 0, 0)),   # x chunk
            pl.BlockSpec((1, Ci, H, W), lambda b, c: (b, 0, 0, 0)),   # img (re-DMA skipped over c)
        ],
        out_specs=tuple(pl.BlockSpec((1,) + _PARTIAL_SHAPE, out_idx)
                        for _ in range(6)),
        compiler_params=pltpu.CompilerParams(
            dimension_semantics=("parallel", "parallel"),
            vmem_limit_bytes=vmem_limit),
        cost_estimate=cost,
    )(x, img)

    m_h = jnp.max(hmx[:, 0, 0])                   # global max over batch (matches torch.max)
    m_w = jnp.max(wmx[:, 0, 0])
    h_total = m_h * jnp.sum(hs2[:, 0, 0]) - jnp.sum(hsi[:, 0, 0])
    w_total = m_w * jnp.sum(ws2[:, 0, 0]) - jnp.sum(wsi[:, 0, 0])
    return h_total, w_total


# -----------------------------------------------------------------------------
# Module wrapper (matches L_TV.forward)
# -----------------------------------------------------------------------------
def l_tv(x, img=None, tv_loss_weight=1.0):
    B, C, H, W = x.shape
    count_h = (H - 1) * W
    count_w = H * (W - 1)
    if img is None:
        h_sum, w_sum = _tv_sums_plain(x)
    else:
        h_sum, w_sum = _tv_sums_weighted(x, img)
    return tv_loss_weight * 2.0 * (h_sum / count_h + w_sum / count_w) / B


# -----------------------------------------------------------------------------
# Pure-JAX reference (mirrors the PyTorch forward exactly)
# -----------------------------------------------------------------------------
def l_tv_ref(x, img=None, tv_loss_weight=1.0):
    B, C, H, W = x.shape
    count_h = (H - 1) * W
    count_w = H * (W - 1)
    h_tv = (x[:, :, 1:, :] - x[:, :, :-1, :]) ** 2
    w_tv = (x[:, :, :, 1:] - x[:, :, :, :-1]) ** 2
    if img is not None:
        gray = jnp.mean(img, axis=1, keepdims=True)
        ih = jnp.abs(gray[:, :, 1:, :] - gray[:, :, :-1, :])
        iw = jnp.abs(gray[:, :, :, 1:] - gray[:, :, :, :-1])
        h_tv = h_tv * (jnp.max(ih) - ih)
        w_tv = w_tv * (jnp.max(iw) - iw)
    return tv_loss_weight * 2.0 * (h_tv.sum() / count_h + w_tv.sum() / count_w) / B


if __name__ == "__main__":
    key = jax.random.PRNGKey(0)
    kx, ki = jax.random.split(key)
    x = jax.random.normal(kx, (2, 4, 16, 16), jnp.float32)
    img = jax.random.uniform(ki, (2, 3, 16, 16), jnp.float32)

    # Path 1: img=None (default forward) — no weight maps are materialized.
    out0 = jax.block_until_ready(l_tv(x))
    ref0 = l_tv_ref(x)
    assert jnp.allclose(out0, ref0, rtol=1e-4, atol=1e-5), (out0, ref0)

    # Path 2: img provided (gray-TV weighted), single fused pass.
    out1 = jax.block_until_ready(l_tv(x, img))
    ref1 = l_tv_ref(x, img)
    assert jnp.allclose(out1, ref1, rtol=1e-4, atol=1e-5), (out1, ref1)

    print("KERNEL_OK")
</pallas_src>

<mosaic_0001>
module attributes {stable_mosaic.version = 11 : i64} {
  func.func @_tv_plain_kernel(%arg0: i32, %arg1: i32, %arg2: memref<1x4x16x16xf32, #tpu.memory_space<vmem>>, %arg3: memref<1x8x128xf32, #tpu.memory_space<vmem>>, %arg4: memref<1x8x128xf32, #tpu.memory_space<vmem>>) attributes {dimension_semantics = [#tpu.dimension_semantics<parallel>, #tpu.dimension_semantics<parallel>], iteration_bounds = array<i64: 2, 1>, scalar_prefetch = 0 : i64, scratch_operands = 0 : i64, tpu.core_type = #tpu.core_type<tc>, window_params = [{transform_indices = @transform_0, window_bounds = array<i64: 1, 4, 16, 16>}, {transform_indices = @transform_1, window_bounds = array<i64: 1, 8, 128>}, {transform_indices = @transform_2, window_bounds = array<i64: 1, 8, 128>}]} {
    %c0 = arith.constant 0 : index
    %c0_0 = arith.constant 0 : index
    %c0_1 = arith.constant 0 : index
    %c0_2 = arith.constant 0 : index
    %0 = vector.load %arg2[%c0, %c0_0, %c0_1, %c0_2] : memref<1x4x16x16xf32, #tpu.memory_space<vmem>>, vector<1x4x16x16xf32>
    %1 = vector.shape_cast %0 : vector<1x4x16x16xf32> to vector<4x16x16xf32>
    %2 = vector.extract_strided_slice %1 {offsets = [0, 1, 0], sizes = [4, 15, 16], strides = [1, 1, 1]} : vector<4x16x16xf32> to vector<4x15x16xf32>
    %3 = vector.extract_strided_slice %1 {offsets = [0, 0, 0], sizes = [4, 15, 16], strides = [1, 1, 1]} : vector<4x16x16xf32> to vector<4x15x16xf32>
    %4 = arith.subf %2, %3 : vector<4x15x16xf32>
    %5 = vector.extract_strided_slice %1 {offsets = [0, 0, 1], sizes = [4, 16, 15], strides = [1, 1, 1]} : vector<4x16x16xf32> to vector<4x16x15xf32>
    %6 = vector.extract_strided_slice %1 {offsets = [0, 0, 0], sizes = [4, 16, 15], strides = [1, 1, 1]} : vector<4x16x16xf32> to vector<4x16x15xf32>
    %7 = arith.subf %5, %6 : vector<4x16x15xf32>
    %8 = arith.mulf %4, %4 : vector<4x15x16xf32>
    %9 = vector.shape_cast %8 : vector<4x15x16xf32> to vector<1x4x15x16xf32>
    %cst = arith.constant dense<0.000000e+00> : vector<1xf32>
    %10 = vector.multi_reduction <add>, %9, %cst [1, 2, 3] : vector<1x4x15x16xf32> to vector<1xf32>
    %11 = vector.shape_cast %10 : vector<1xf32> to vector<1x1x1x1xf32>
    %12 = vector.extract %11[0, 0, 0, 0] : f32 from vector<1x1x1x1xf32>
    %13 = vector.broadcast %12 : f32 to vector<1x8x128xf32>
    %c0_3 = arith.constant 0 : index
    %c0_4 = arith.constant 0 : index
    %c0_5 = arith.constant 0 : index
    %14 = vector.load %arg3[%c0_3, %c0_4, %c0_5] : memref<1x8x128xf32, #tpu.memory_space<vmem>>, vector<1x8x128xf32>
    tpu.vector_store %arg3[%c0_3, %c0_4, %c0_5], %13 {strides = array<i32>} : memref<1x8x128xf32, #tpu.memory_space<vmem>>, vector<1x8x128xf32>,
    %15 = arith.mulf %7, %7 : vector<4x16x15xf32>
    %16 = vector.shape_cast %15 : vector<4x16x15xf32> to vector<1x4x16x15xf32>
    %cst_6 = arith.constant dense<0.000000e+00> : vector<1xf32>
    %17 = vector.multi_reduction <add>, %16, %cst_6 [1, 2, 3] : vector<1x4x16x15xf32> to vector<1xf32>
    %18 = vector.shape_cast %17 : vector<1xf32> to vector<1x1x1x1xf32>
    %19 = vector.extract %18[0, 0, 0, 0] : f32 from vector<1x1x1x1xf32>
    %20 = vector.broadcast %19 : f32 to vector<1x8x128xf32>
    %c0_7 = arith.constant 0 : index
    %c0_8 = arith.constant 0 : index
    %c0_9 = arith.constant 0 : index
    %21 = vector.load %arg4[%c0_7, %c0_8, %c0_9] : memref<1x8x128xf32, #tpu.memory_space<vmem>>, vector<1x8x128xf32>
    tpu.vector_store %arg4[%c0_7, %c0_8, %c0_9], %20 {strides = array<i32>} : memref<1x8x128xf32, #tpu.memory_space<vmem>>, vector<1x8x128xf32>,
    return
  }
  func.func @transform_0(%arg0: i32, %arg1: i32) -> (i32, i32, i32, i32) {
    %c0_i32 = arith.constant 0 : i32
    %c0_i32_0 = arith.constant 0 : i32
    %c0_i32_1 = arith.constant 0 : i32
    return %arg0, %arg1, %c0_i32, %c0_i32_0 : i32, i32, i32, i32
  }
  func.func @transform_1(%arg0: i32, %arg1: i32) -> (i32, i32, i32) {
    %c1_i32 = arith.constant 1 : i32
    %0 = arith.muli %arg0, %c1_i32 : i32
    %1 = arith.addi %0, %arg1 : i32
    %c0_i32 = arith.constant 0 : i32
    %c0_i32_0 = arith.constant 0 : i32
    %c0_i32_1 = arith.constant 0 : i32
    return %1, %c0_i32, %c0_i32_0 : i32, i32, i32
  }
  func.func @transform_2(%arg0: i32, %arg1: i32) -> (i32, i32, i32) {
    %c1_i32 = arith.constant 1 : i32
    %0 = arith.muli %arg0, %c1_i32 : i32
    %1 = arith.addi %0, %arg1 : i32
    %c0_i32 = arith.constant 0 : i32
    %c0_i32_0 = arith.constant 0 : i32
    %c0_i32_1 = arith.constant 0 : i32
    return %1, %c0_i32, %c0_i32_0 : i32, i32, i32
  }
}

</mosaic_0001>

<bundles_post_ra>
// kernel: tpu_custom_call.1
= control target key start
LH: loop header
LB: loop body
LE: loop exit
PB: predicated region body
PF: predicated region fallthrough
CT: control target
= control target key end

     0   :  { %8 = vsyncpa [#allocation3], 0  ;;  %s1071_s0 = inlined_call_operand.hbm [shape: f32[2,4,16,16], index: 0, kind: input, shape index: {}]   ;;  %s1072_s1 = inlined_call_operand.hbm [shape: f32[2,8,128], index: 1, kind: output, shape index: {0}]   ;;  %s1073_s2 = inlined_call_operand.hbm [shape: f32[2,8,128], index: 2, kind: output, shape index: {1}]  }
   0x1   :  { %10 = vsyncpa [#allocation3 + $0x1], 0 }
   0x2   :  { %11 = vsyncpa [#allocation4], 0 }
   0x3   :  { %13 = vsyncpa [#allocation4 + $0x1], 0 }
   0x4   :  { %14 = vsyncpa [#allocation7], 0 }
   0x5   :  { %16 = vsyncpa [#allocation7 + $0x1], 0  ;;  %s816_s9 = smov 0   ;;  %s818_s10 = smov 0  }
   0x6   :  { %s820_s11 = smov 0   ;;  %s822_s12 = smov 0  }
   0x7   :  { %s824_s13 = smov 0   ;;  %s826_s14 = smov 0  }
   0x8 LB: > { %s555_s15 = sadd.s32 4294967295, %s792_s14   ;;  %s556_s16 = sadd.s32 4294967294, %s792_s14   ;;  %s792_s14 = sphi %s826_s14, %s22_s14   ;;  %s788_s13 = sphi %s824_s13, %s1088_s13   ;;  %s784_s12 = sphi %s822_s12, %s1087_s12   ;;  %s780_s11 = sphi %s820_s11, %s1086_s11   ;;  %s776_s10 = sphi %s818_s10, %s1085_s10   ;;  %s772_s9 = sphi %s816_s9, %s1084_s9  }
   0x9   : > { %s34_s17 = sadd.s32 1, %s788_s13  ;;  %s43_s18 = sadd.s32 1, %s780_s11 }
   0xa   : > { %p36_p0 = scmp.ge.s32.totalorder %s34_s17, 2  ;;  %p50_p1 = scmp.ne.s32.totalorder %s780_s11, %s776_s10 }
   0xb   : > { %p51_p2 = scmp.eq.s32.totalorder %s792_s14, 0  ;;  %p56_p3 = scmp.ne.s32.totalorder %s776_s10, %s772_s9 }
   0xc   : > { %s1090_s17 = smov (%p36_p0, %s34_s17), 0  ;;  %p57_p5 = scmp.eq.s32.totalorder %s555_s15, 0 }
   0xd   : > { %p857_p4 = por %p51_p2, %p50_p1  ;;  %s38_s20 = ssub.s32 %s788_s13, %s1090_s17 }
   0xe   : > { %p82_p6 = scmp.eq.s32.totalorder %s555_s15, 1  ;;  %p41_p7 = scmp.eq.s32.totalorder %s38_s20, 0 }
   0xf   : > { %p863_p8 = por %p57_p5, %p56_p3  ;;  %p88_p10 = scmp.eq.s32.totalorder %s556_s16, 1 }
  0x10   : > { %p867_p9 = por %p82_p6, %p50_p1  ;;  %p594_p13 = scmp.lt.s32.totalorder %s792_s14, 2 }
  0x11   : > { %s872_s23 = scalar_select %p41_p7, %s780_s11, %s43_s18  }
  0x12   : > { %s1077_s22 = scalar_select %p867_p9, 1, 0 }
  0x13   : > { %p874_p11 = por %p88_p10, %p56_p3  ;;  %s136_s25 = sand.u32 1, %s780_s11  }
  0x14   : > { %s559_s26 = sshll.u32 %s136_s25, 6  ;;  %s572_s27 = sshll.u32 %s788_s13, 10 }
  0x15   : > { %s1078_s24 = scalar_select %p874_p11, 1, 0 }
  0x16   : > { %s885_s30 = scalar_lea.hbm %s1071_s0, %s572_s27  ;;  %s140_s3 = scalar_lea.vmem [#allocation2], %s559_s26 }
  0x17   : > { %s150_s4 = sshll.u32 %s140_s3, 4  ;;  %p891_p0 = pnand %p594_p13, %p857_p4  ;;  %s887_s4 = int_to_ptr.vmem [resolvable:$true] %s150_s4 }
  0x18   : > { %s896_s6 = scalar_lea.sflag [#allocation3], %s136_s25  ;;  %s648_s7 = scalar_lea.hbm %s885_s30, 1024 }
  0x19   : > { %p649_p2 = scmp.ne.s32.totalorder %s885_s30, %s648_s7  ;;  %p650_p3 = pneg %p891_p0 }
  0x1a   : > { %s653_s16 = scalar_lea.hbm %s1071_s0, 2048  ;;  %p654_p4 = scmp.lt.u32.totalorder %s885_s30, %s1071_s0 }
  0x1b   : > { %p651_p5 = pnand %p650_p3, %p649_p2  ;;  %p655_p7 = scmp.lt.u32.totalorder %s653_s16, %s648_s7 }
  0x1c   : > { %p657_p13 = scmp.lt.u32.totalorder %s648_s7, %s885_s30 }
  0x1d   : > { %p652_p6 = pneg %p651_p5  ;;  %p656_p10 = por %p655_p7, %p654_p4 }
  0x1f   : > { %p658_p12 = por %p657_p13, %p656_p10 }
  0x21   : > { %p659_p1 = pnand %p658_p12, %p652_p6 }
  0x23   : > { %662 = shalt.err (!%p659_p1)
}
  0x24   : > { %s663_s20 = scalar_lea.vmem %s887_s4, 1024  ;;  %s794_s25 = smov [#allocation2]  }
  0x25   : > { %p664_p2 = scmp.ne.s32.totalorder %s887_s4, %s663_s20  ;;  %s668_s26 = sshll.u32 %s794_s25, 4  ;;  %s669_s26 = int_to_ptr.vmem [resolvable:$false] %s668_s26 }
  0x26   : > { %s670_s27 = scalar_lea.vmem %s669_s26, 2048  ;;  %p671_p9 = scmp.lt.s32.totalorder %s887_s4, %s669_s26 }
  0x27   : > { %p666_p5 = pnand %p664_p2, %p650_p3  ;;  %p672_p4 = scmp.lt.s32.totalorder %s670_s27, %s663_s20 }
  0x29   : > { %p667_p11 = pneg %p666_p5  ;;  %p673_p7 = por %p672_p4, %p671_p9 }
  0x2b   : > { %p674_p10 = pnand %p673_p7, %p667_p11 }
  0x2d   : > { %677 = shalt.err (!%p674_p10)
}
  0x2e   : > { %s795_s28 = smov 128   ;;  %s796_s29 = smov 8  }
  0x2f   : > { %586 = dma.hbm_to_vmem [thread:$0]  (!%p891_p0), %s885_s30, 1024, %s887_s4, %s896_s6, %s795_s28, %s795_s28, %s796_s29  }
  0x30   : > { %p158_p12 = scmp.lt.s32.totalorder %s792_s14, 3  ;;  %p1080_p1 = scmp.ge.s32.totalorder %s792_s14, 1 }
  0x32   : > { %p159_p3 = pnand %p1080_p1, %p158_p12 }
  0x33   : > { %s928_s3 = sand.u32 (!%p159_p3), 1, %s776_s10  }
  0x34   : > { %162 = sbr.rel (%p159_p3) target bundleno = 533 (0x215), region = 24  ;;  %s563_s7 = sshll.u32 (!%p159_p3), %s928_s3, 6 }
  0x35   : > { %s165_s8 = scalar_lea.sflag (!%p159_p3), [#allocation3], %s928_s3  ;;  %s168_s15 = scalar_lea.vmem (!%p159_p3), [#allocation2], %s563_s7 }
  0x3b   : > { %759 = dma.done.wait (%p863_p8), %s165_s8, 1024  }
  0x3c   : > { %761 = vsyncadd (%p863_p8), %s165_s8, 4294966272  ;;  %v197_v0 = vld [vmem:[%s168_s15] sm:$0xff]  ;;  %v199_v1 = vld [vmem:[%s168_s15 + $0x10] sm:$0xff]  ;;  %s797_s30 = smov 1   ;;  %vm213_vm0 = vcmask 1040384   ;;  %s798_s21 = smov 127  }
  0x3d   : > { %242 = vrot.lane.b32.xlu0 %v197_v0, %s797_s30  ;;  %246 = vrot.lane.b32.xlu1 %v199_v1, %s797_s30  ;;  %v198_v2 = vld [vmem:[%s168_s15 + $0x8] sm:$0xff]  ;;  %v200_v3 = vld [vmem:[%s168_s15 + $0x18] sm:$0xff]  ;;  %v214_v8 = vrot.slane %v197_v0, 7  ;;  %v217_v10 = vrot.slane %v199_v1, 7  ;;  %vm290_vm1 = vcmask 1046528   ;;  %vm311_vm2 = vcmask 130048  }
  0x3e   : > { %v201_v4 = vld [vmem:[%s168_s15 + $0x20] sm:$0xff]  ;;  %v202_v5 = vld [vmem:[%s168_s15 + $0x28] sm:$0xff]  ;;  %v936_v6 = vld [vmem:[%s168_s15 + $0x30] sm:$0xff]  ;;  %v215_v9 = vrot.slane %v198_v2, 7  ;;  %v218_v12 = vrot.slane %v200_v3, 7  ;;  %vm313_vm3 = vcmask 129024  }
  0x3f   : > { %v938_v7 = vld [vmem:[%s168_s15 + $0x38] sm:$0xff]  ;;  %v234_v17 = vsub.f32 %v197_v0, %v214_v8  ;;  %v236_v21 = vsub.f32 %v199_v1, %v217_v10  ;;  %v220_v22 = vrot.slane %v201_v4, 7  ;;  %v221_v23 = vrot.slane %v202_v5, 7  ;;  %s564_s4 = sshll.u32 %s928_s3, 3  ;;  %s568_s5 = sshll.u32 %s784_s12, 7 }
  0x40   : > { %v216_v11 = vsel %vm213_vm0, %v214_v8, %v215_v9  ;;  %v219_v19 = vsel %vm213_vm0, %v217_v10, %v218_v12  ;;  %v223_v54 = vrot.slane %v936_v6, 7  ;;  %v224_v55 = vrot.slane %v938_v7, 7  ;;  %s186_s6 = scalar_lea.vmem [#allocation5], %s564_s4  ;;  %s989_s20 = scalar_lea.hbm %s1072_s1, %s568_s5 }
  0x41   : > { %244 = vrot.lane.b32.xlu0 %v198_v2, %s797_s30  ;;  %248 = vrot.lane.b32.xlu1 %v200_v3, %s797_s30  ;;  %v235_v18 = vsub.f32 %v198_v2, %v216_v11  ;;  %v274_v29 = vmul.f32 %v234_v17, %v234_v17  ;;  %v237_v31 = vsub.f32 %v200_v3, %v219_v19  ;;  %vm379_vm4 = vcmask 121856   ;;  %s426_s16 = sshll.u32 %s186_s6, 4  ;;  %s407_s26 = scalar_lea.sflag [#allocation4], %s928_s3  ;;  %s991_s16 = int_to_ptr.vmem [resolvable:$true] %s426_s16 }
  0x42   : > { %v276_v33 = vmul.f32 %v236_v21, %v236_v21  ;;  %v222_v34 = vsel %vm213_vm0, %v220_v22, %v221_v23  ;;  %v238_v44 = vsub.f32 %v201_v4, %v220_v22  ;;  %v225_v63 = vsel %vm213_vm0, %v223_v54, %v224_v55  ;;  %s678_s27 = scalar_lea.vmem %s991_s16, 128  ;;  %p1081_p9 = scmp.ne.s32.totalorder %s1077_s22, 0 }
  0x43   : > { %v275_v30 = vmul.f32 %v235_v18, %v235_v18  ;;  %v291_v40 = vrot.slane %v274_v29, 1  ;;  %v277_v42 = vmul.f32 %v237_v31, %v237_v31  ;;  %v239_v45 = vsub.f32 %v202_v5, %v222_v34  ;;  %p679_p8 = scmp.ne.s32.totalorder %s991_s16, %s678_s27  ;;  %s799_s28 = smov [#allocation5]  }
  0x44   : > { %v294_v48 = vrot.slane %v276_v33, 1  ;;  %v278_v60 = vmul.f32 %v238_v44, %v238_v44  ;;  %s682_s29 = sshll.u32 %s799_s28, 4  ;;  %s683_s29 = int_to_ptr.vmem [resolvable:$false] %s682_s29 }
  0x45   : > { %250 = vrot.lane.b32.xlu0 %v201_v4, %s797_s30  ;;  %252 = vrot.lane.b32.xlu1 %v202_v5, %s797_s30  ;;  %v292_v41 = vrot.slane %v275_v30, 1  ;;  %v295_v52 = vrot.slane %v277_v42, 1  ;;  %v279_v61 = vmul.f32 %v239_v45, %v239_v45  ;;  %p680_p11 = pnand %p679_p8, %p1081_p9  ;;  %s684_s7 = scalar_lea.vmem %s683_s29, 256 }
  0x46   : > { %p685_p6 = scmp.lt.s32.totalorder %s991_s16, %s683_s29  ;;  %p686_p13 = scmp.lt.s32.totalorder %s684_s7, %s678_s27 }
  0x47   : > { %v293_v53 = vsel %vm290_vm1, %v291_v40, %v292_v41  ;;  %v314_v59 = vsel %vm313_vm3, %v292_v41, 0.0  ;;  %v296_v62 = vsel %vm290_vm1, %v294_v48, %v295_v52  ;;  %v318_v9 = vsel %vm313_vm3, %v295_v52, 0.0  ;;  %p681_p0 = pneg %p680_p11 }
  0x48   : > { %v312_v58 = vsel %vm311_vm2, %v293_v53, 0.0  ;;  %p687_p2 = por %p686_p13, %p685_p6 }
  0x49   : > { %254 = vrot.lane.b32.xlu0 %v936_v6, %s797_s30  ;;  %256 = vrot.lane.b32.xlu1 %v938_v7, %s797_s30 }
  0x4a   : > { %p688_p5 = pnand %p687_p2, %p681_p0 }
  0xaf   : > { %v243_v13 = vpop.permute.xlu0 %242  ;;  %v247_v14 = vpop.permute.xlu1 %246 }
  0xb0   : > { %v266_v15 = vsub.f32 %v197_v0, %v243_v13  ;;  %v268_v16 = vsub.f32 %v199_v1, %v247_v14  ;;  %v315_v0 = vadd.f32 %v314_v59, %v312_v58  ;;  %v316_v1 = vsel %vm311_vm2, %v296_v62, 0.0 }
  0xb2   : > { %v339_v20 = vmul.f32 %v266_v15, %v266_v15  ;;  %v341_v26 = vmul.f32 %v268_v16, %v268_v16  ;;  %v317_v8 = vadd.f32 %v316_v1, %v315_v0 }
  0xb3   : > { %v245_v24 = vpop.permute.xlu0 %244  ;;  %v249_v25 = vpop.permute.xlu1 %248 }
  0xb4   : > { %v267_v27 = vsub.f32 %v198_v2, %v245_v24  ;;  %355 = vrot.lane.b32.xlu0 %v339_v20, %s798_s21  ;;  %v269_v28 = vsub.f32 %v200_v3, %v249_v25  ;;  %v297_v2 = vrot.slane %v278_v60, 1  ;;  %v240_v3 = vsub.f32 %v936_v6, %v223_v54 }
  0xb5   : > { %v319_v13 = vadd.f32 %v318_v9, %v317_v8 }
  0xb6   : > { %v340_v32 = vmul.f32 %v267_v27, %v267_v27  ;;  %v342_v37 = vmul.f32 %v269_v28, %v269_v28  ;;  %v280_v10 = vmul.f32 %v240_v3, %v240_v3 }
  0xb7   : > { %v251_v35 = vpop.permute.xlu0 %250  ;;  %v253_v36 = vpop.permute.xlu1 %252 }
  0xb8   : > { %359 = vrot.lane.b32.xlu0 %v341_v26, %s798_s21  ;;  %357 = vrot.lane.b32.xlu1 %v340_v32, %s798_s21  ;;  %v270_v38 = vsub.f32 %v201_v4, %v251_v35  ;;  %v271_v39 = vsub.f32 %v202_v5, %v253_v36  ;;  %v241_v4 = vsub.f32 %v938_v7, %v225_v63  ;;  %v298_v5 = vrot.slane %v279_v61, 1 }
  0xb9   : > { %v300_v15 = vrot.slane %v280_v10, 1 }
  0xba   : > { %v343_v43 = vmul.f32 %v270_v38, %v270_v38  ;;  %v344_v49 = vmul.f32 %v271_v39, %v271_v39  ;;  %v281_v11 = vmul.f32 %v241_v4, %v241_v4  ;;  %v299_v12 = vsel %vm290_vm1, %v297_v2, %v298_v5 }
  0xbb   : > { %v255_v46 = vpop.permute.xlu0 %254  ;;  %v257_v47 = vpop.permute.xlu1 %256  ;;  %v320_v14 = vsel %vm311_vm2, %v299_v12, 0.0  ;;  %v322_v18 = vsel %vm313_vm3, %v298_v5, 0.0 }
  0xbc   : > { %361 = vrot.lane.b32.xlu1 %v342_v37, %s798_s21  ;;  %v272_v50 = vsub.f32 %v936_v6, %v255_v46  ;;  %363 = vrot.lane.b32.xlu0 %v343_v43, %s798_s21  ;;  %v273_v51 = vsub.f32 %v938_v7, %v257_v47  ;;  %v301_v16 = vrot.slane %v281_v11, 1  ;;  %v321_v17 = vadd.f32 %v320_v14, %v319_v13 }
  0xbe   : > { %v345_v56 = vmul.f32 %v272_v50, %v272_v50  ;;  %v346_v57 = vmul.f32 %v273_v51, %v273_v51  ;;  %v302_v6 = vsel %vm290_vm1, %v300_v15, %v301_v16  ;;  %v323_v19 = vadd.f32 %v322_v18, %v321_v17 }
  0xbf   : > { %v324_v7 = vsel %vm311_vm2, %v302_v6, 0.0  ;;  %v326_v21 = vsel %vm313_vm3, %v301_v16, 0.0 }
  0xc0   : > { %365 = vrot.lane.b32.xlu1 %v344_v49, %s798_s21  ;;  %367 = vrot.lane.b32.xlu0 %v345_v56, %s798_s21  ;;  %v325_v20 = vadd.f32 %v324_v7, %v323_v19 }
  0xc2   : > { %v327_v22 = vadd.f32 %v326_v21, %v325_v20 }
  0xc4   : > { %369 = vrot.lane.b32.xlu1 %v346_v57, %s798_s21 }
  0xdf   : > { %328 = vadd.xlane.f32.xlu0 %v327_v22 }
 0x126   : > { %v356_v23 = vpop.permute.xlu0 %355 }
 0x127   : > { %v380_v26 = vsel %vm379_vm4, %v356_v23, 0.0 }
 0x12a   : > { %v358_v24 = vpop.permute.xlu1 %357  ;;  %v360_v25 = vpop.permute.xlu0 %359 }
 0x12b   : > { %v381_v27 = vsel %vm379_vm4, %v358_v24, 0.0  ;;  %v383_v29 = vsel %vm379_vm4, %v360_v25, 0.0 }
 0x12c   : > { %v382_v28 = vadd.f32 %v381_v27, %v380_v26 }
 0x12e   : > { %v384_v30 = vadd.f32 %v383_v29, %v382_v28  ;;  %v362_v31 = vpop.permute.xlu1 %361  ;;  %v364_v32 = vpop.permute.xlu0 %363 }
 0x12f   : > { %v385_v33 = vsel %vm379_vm4, %v362_v31, 0.0  ;;  %v387_v34 = vsel %vm379_vm4, %v364_v32, 0.0 }
 0x130   : > { %v386_v35 = vadd.f32 %v385_v33, %v384_v30 }
 0x132   : > { %v388_v36 = vadd.f32 %v387_v34, %v386_v35  ;;  %v366_v37 = vpop.permute.xlu1 %365  ;;  %v368_v38 = vpop.permute.xlu0 %367 }
 0x133   : > { %v389_v39 = vsel %vm379_vm4, %v366_v37, 0.0  ;;  %v391_v40 = vsel %vm379_vm4, %v368_v38, 0.0 }
 0x134   : > { %v390_v41 = vadd.f32 %v389_v39, %v388_v36 }
 0x136   : > { %v392_v42 = vadd.f32 %v391_v40, %v390_v41  ;;  %v370_v43 = vpop.permute.xlu1 %369 }
 0x137   : > { %v393_v44 = vsel %vm379_vm4, %v370_v43, 0.0 }
 0x138   : > { %v394_v45 = vadd.f32 %v393_v44, %v392_v42 }
 0x13a   : > { %395 = vadd.xlane.f32.xlu1 %v394_v45 }
 0x16c   : > { %v329_v46 = vpop.xlane.xlu0 %328 }
 0x16d   : > { %v330_v47 = vrot.slane %v329_v46, 4 }
 0x16f   : > { %v331_v48 = vadd.f32 %v330_v47, %v329_v46 }
 0x171   : > { %v332_v49 = vrot.slane %v331_v48, 2 }
 0x173   : > { %v333_v50 = vadd.f32 %v332_v49, %v331_v48 }
 0x175   : > { %v334_v51 = vrot.slane %v333_v50, 1 }
 0x177   : > { %v335_v52 = vadd.f32 %v334_v51, %v333_v50 }
 0x179   : > { %573 = vpush %v335_v52 }
 0x1aa   : > { %s574_s25 = spop %573 }
 0x1ab   : > { %v337_v53 = vstv %s574_s25 }
 0x1ac   : > { %338 = vst [vmem:[%s186_s6] sm:$0xff] %v337_v53 }
 0x1ad   : > { %691 = shalt.err (!%p688_p5)
}
 0x1ae   : > { %s692_s8 = scalar_lea.hbm %s989_s20, 128  ;;  %s696_s21 = scalar_lea.hbm %s1072_s1, 256 }
 0x1af   : > { %p693_p4 = scmp.ne.s32.totalorder %s989_s20, %s692_s8  ;;  %p697_p12 = scmp.lt.u32.totalorder %s989_s20, %s1072_s1 }
 0x1b0   : > { %p698_p1 = scmp.lt.u32.totalorder %s696_s21, %s692_s8  ;;  %p700_p8 = scmp.lt.u32.totalorder %s692_s8, %s989_s20 }
 0x1b1   : > { %p694_p7 = pnand %p693_p4, %p1081_p9 }
 0x1b2   : > { %p699_p3 = por %p698_p1, %p697_p12 }
 0x1b3   : > { %p695_p10 = pneg %p694_p7 }
 0x1b4   : > { %p701_p11 = por %p700_p8, %p699_p3 }
 0x1b6   : > { %p702_p0 = pnand %p701_p11, %p695_p10 }
 0x1b8   : > { %705 = shalt.err (!%p702_p0)
}
 0x1b9   : > { %579 = dma.vmem_to_hbm [thread:$0]  (%p1081_p9), %s991_s16, 128, %s989_s20, %s407_s26  }
 0x1ba   : > { %s193_s19 = scalar_lea.vmem [#allocation6], %s564_s4  ;;  %s1024_s26 = scalar_lea.hbm %s1073_s2, %s568_s5 }
 0x1bb   : > { %s440_s25 = sshll.u32 %s193_s19, 4  ;;  %s412_s28 = scalar_lea.sflag [#allocation7], %s928_s3  ;;  %s1017_s25 = int_to_ptr.vmem [resolvable:$true] %s440_s25 }
 0x1bc   : > { %s706_s29 = scalar_lea.vmem %s1017_s25, 128  ;;  %s800_s4 = smov [#allocation6]  }
 0x1bd   : > { %p707_p6 = scmp.ne.s32.totalorder %s1017_s25, %s706_s29  ;;  %s710_s7 = sshll.u32 %s800_s4, 4  ;;  %s711_s7 = int_to_ptr.vmem [resolvable:$false] %s710_s7 }
 0x1be   : > { %s712_s8 = scalar_lea.vmem %s711_s7, 256  ;;  %p713_p5 = scmp.lt.s32.totalorder %s1017_s25, %s711_s7 }
 0x1bf   : > { %p708_p13 = pnand %p707_p6, %p1081_p9  ;;  %p714_p4 = scmp.lt.s32.totalorder %s712_s8, %s706_s29 }
 0x1c1   : > { %p709_p2 = pneg %p708_p13  ;;  %p715_p7 = por %p714_p4, %p713_p5 }
 0x1c3   : > { %p716_p10 = pnand %p715_p7, %p709_p2 }
 0x1c7   : > { %v396_v54 = vpop.xlane.xlu1 %395 }
 0x1c8   : > { %v397_v55 = vrot.slane %v396_v54, 4 }
 0x1ca   : > { %v398_v56 = vadd.f32 %v397_v55, %v396_v54 }
 0x1cc   : > { %v399_v57 = vrot.slane %v398_v56, 2 }
 0x1ce   : > { %v400_v58 = vadd.f32 %v399_v57, %v398_v56 }
 0x1d0   : > { %v401_v59 = vrot.slane %v400_v58, 1 }
 0x1d2   : > { %v402_v60 = vadd.f32 %v401_v59, %v400_v58 }
 0x1d4   : > { %575 = vpush %v402_v60 }
 0x205   : > { %s576_s27 = spop %575 }
 0x206   : > { %v404_v61 = vstv %s576_s27 }
 0x207   : > { %405 = vst [vmem:[%s193_s19] sm:$0xff] %v404_v61 }
 0x208   : > { %719 = shalt.err (!%p716_p10)
}
 0x209   : > { %s720_s12 = scalar_lea.hbm %s1024_s26, 128  ;;  %s724_s15 = scalar_lea.hbm %s1073_s2, 256 }
 0x20a   : > { %p721_p12 = scmp.ne.s32.totalorder %s1024_s26, %s720_s12  ;;  %p725_p8 = scmp.lt.u32.totalorder %s1024_s26, %s1073_s2 }
 0x20b   : > { %p726_p11 = scmp.lt.u32.totalorder %s724_s15, %s720_s12  ;;  %p728_p6 = scmp.lt.u32.totalorder %s720_s12, %s1024_s26 }
 0x20c   : > { %p722_p1 = pnand %p721_p12, %p1081_p9 }
 0x20d   : > { %p727_p0 = por %p726_p11, %p725_p8 }
 0x20e   : > { %p723_p3 = pneg %p722_p1 }
 0x20f   : > { %p729_p13 = por %p728_p6, %p727_p0 }
 0x211   : > { %p730_p2 = pnand %p729_p13, %p723_p3 }
 0x213   : > { %733 = shalt.err (!%p730_p2)
}
 0x214   : > { %580 = dma.vmem_to_hbm [thread:$0]  (%p1081_p9), %s1017_s25, 128, %s1024_s26, %s412_s28  }
 0x215 PF: > { %s452_s6 = sand.u32 1, %s772_s9   ;;  %p1082_p5 = scmp.ne.s32.totalorder %s1078_s24, 0 }
 0x216   : > { %p1083_p4 = scmp.ge.s32.totalorder %s792_s14, 2  ;;  %s453_s18 = scalar_lea.sflag [#allocation4], %s452_s6 }
 0x218   : > { %p588_p7 = pnand %p1083_p4, %p1082_p5 }
 0x21a   : > { %763 = dma.done.wait (!%p588_p7), %s453_s18, 128  }
 0x21b   : > { %765 = vsyncadd (!%p588_p7), %s453_s18, 4294967168  ;;  %s462_s19 = scalar_lea.sflag [#allocation7], %s452_s6 }
 0x21c   : > { %767 = dma.done.wait (!%p588_p7), %s462_s19, 128  }
 0x21d   : > { %769 = vsyncadd (!%p588_p7), %s462_s19, 4294967168  ;;  %s22_s14 = sadd.s32 1, %s792_s14   ;;  %s1084_s9 = smov %s776_s10 }
 0x21e   : > { %p19_p10 = scmp.ge.s32.totalorder %s22_s14, 4   ;;  %s1085_s10 = smov %s780_s11 }
 0x21f   : > { %s1086_s11 = smov %s872_s23  ;;  %s1087_s12 = smov %s788_s13 }
 0x220   : > { %s1088_s13 = smov %s1090_s17  ;;  %21 = sbr.rel (!%p19_p10) target bundleno = 8 (0x8), region = 86 }
 0x227   :  { %467 = vsyncpa [#allocation3], 1 }
 0x228   :  { %469 = vsyncpa [#allocation3 + $0x1], 1 }
 0x229   :  { %470 = vsyncpa [#allocation4], 1 }
 0x22a   :  { %472 = vsyncpa [#allocation4 + $0x1], 1 }
 0x22b   :  { %473 = vsyncpa [#allocation7], 1 }
 0x22c   :  { %475 = vsyncpa [#allocation7 + $0x1], 1 }

</bundles_post_ra>
